<compile_context>
chip_gen: v7x
topology: tpu7x:2x2x1
jax: 0.10.0
libtpu: 0.0.40
codegen_flags: <defaults>
</compile_context>

<pallas_src>
import jax
import jax.numpy as jnp
from jax.experimental import pallas as pl
from jax.experimental.pallas import tpu as pltpu


def _irt1pl_kernel(xT_ref, w0_ref, b0_ref, w1c_ref, b1_ref, d_ref):
    """One batch tile, batch on lanes.

    xT:  [F, TB]   item features, batch on the lane (last) dim
    w0:  [H, F]    first Linear weight, PyTorch-native [out, in]
    b0:  [H, 1]    first Linear bias as a column (broadcasts over lanes)
    w1c: [H, 1]    second Linear weight as a column
    b1:  [1, 1]    second Linear bias (SMEM scalar)
    d:   [1, TB]   item difficulty (lane-dense output)
    """
    # [H, F] @ [F, TB] -> [H, TB] on the MXU, f32 accumulation.
    h = jnp.tanh(
        jnp.dot(w0_ref[...], xT_ref[...], preferred_element_type=jnp.float32)
        + b0_ref[...]
    )
    # Second Linear has out_features=1: VPU multiply + sublane (XLU) reduce
    # instead of an M=1 MXU matmul.
    d = jnp.sum(h * w1c_ref[...], axis=0, keepdims=True) + b1_ref[0, 0]
    d_ref[...] = d.astype(d_ref.dtype)


def irt1pl_forward(item_repr, tester_id, params, *, batch_tile=512,
                   use_bf16_matmul=False):
    """item_repr: [B, F] f32, tester_id: [B] int32."""
    B, F = item_repr.shape
    H = params["w0"].shape[0]          # PyTorch-native w0: [H, F]

    # Lane-dense layout: batch on the lane (last) dim.
    xT = item_repr.T                   # [F, B]
    w0 = params["w0"]                  # [H, F]
    b0c = params["b0"].reshape(H, 1)   # [H, 1]
    w1c = params["w1"].reshape(H, 1)   # [H, 1]  (w1 is [1, H])
    b1 = params["b1"].reshape(1, 1).astype(jnp.float32)  # [1, 1] SMEM scalar

    if use_bf16_matmul:                # v5e / v6e: feed the MXU in bf16
        xT = xT.astype(jnp.bfloat16)
        w0 = w0.astype(jnp.bfloat16)

    # Batch tile: single full-width block for small B, otherwise a 128-multiple
    # tile with zero padding (padded columns are sliced off afterwards).
    if B <= batch_tile:
        TB, Bp = B, B
    else:
        TB = batch_tile
        Bp = pl.cdiv(B, TB) * TB
        if Bp != B:
            xT = jnp.pad(xT, ((0, 0), (0, Bp - B)))

    d_row = pl.pallas_call(
        _irt1pl_kernel,
        out_shape=jax.ShapeDtypeStruct((1, Bp), jnp.float32),
        grid_spec=pltpu.PrefetchScalarGridSpec(
            num_scalar_prefetch=0,
            grid=(Bp // TB,),
            in_specs=[
                pl.BlockSpec((F, TB), lambda i: (0, i)),   # x tile, batch on lanes
                pl.BlockSpec((H, F), lambda i: (0, 0)),    # w0 (resident)
                pl.BlockSpec((H, 1), lambda i: (0, 0)),    # b0 column
                pl.BlockSpec((H, 1), lambda i: (0, 0)),    # w1 column
                pl.BlockSpec(memory_space=pltpu.MemorySpace.SMEM),  # b1 scalar
            ],
            out_specs=pl.BlockSpec((1, TB), lambda i: (0, i)),
        ),
        compiler_params=pltpu.CompilerParams(
            dimension_semantics=("parallel",)),
    )(xT, w0, b0c, w1c, b1)

    d = d_row[0, :B].reshape(B, 1)     # [B, 1]

    # Glue kept in XLA: data-dependent embedding gather + trivial subtraction
    # (fuses with the gather); the kernel stays single-output and theta-free.
    theta = jnp.take(params["theta_table"], tester_id, axis=0)  # [B, 1]
    logits = theta - d
    return {"logits": logits, "difficulty": d, "ability": d}


def init_params(key, item_ftr_dim, num_testers):
    """Deterministic init mirroring nn.Linear / nn.Embedding shapes.

    Weights are kept PyTorch-native: w0 [H, F], b0 [H], w1 [1, H], b1 [1]."""
    H = item_ftr_dim // 2
    k0, k1, k2, k3, k4 = jax.random.split(key, 5)
    bound0 = 1.0 / (item_ftr_dim ** 0.5)
    bound1 = 1.0 / (H ** 0.5)
    return {
        "theta_table": jax.random.normal(k0, (num_testers, 1), jnp.float32),
        "w0": jax.random.uniform(k1, (H, item_ftr_dim), jnp.float32,
                                 -bound0, bound0),
        "b0": jax.random.uniform(k2, (H,), jnp.float32, -bound0, bound0),
        "w1": jax.random.uniform(k3, (1, H), jnp.float32, -bound1, bound1),
        "b1": jax.random.uniform(k4, (1,), jnp.float32, -bound1, bound1),
    }


def _reference(item_repr, tester_id, params):
    theta = jnp.take(params["theta_table"], tester_id, axis=0)
    h = jnp.tanh(item_repr @ params["w0"].T + params["b0"])
    d = h @ params["w1"].T + params["b1"]
    return {"logits": theta - d, "difficulty": d, "ability": d}


if __name__ == "__main__":
    NUM_TESTERS = 10
    key = jax.random.PRNGKey(0)
    kx, kt, kp = jax.random.split(key, 3)

    # Small shapes consistent with the module: batch=8, item_ftr_dim=32 (H=16).
    B, F = 8, 32
    params = init_params(kp, F, NUM_TESTERS)
    item_repr = jax.random.normal(kx, (B, F), jnp.float32)
    tester_id = jax.random.randint(kt, (B,), 0, NUM_TESTERS, jnp.int32)

    out = irt1pl_forward(item_repr, tester_id, params)
    jax.block_until_ready(out)
    ref = _reference(item_repr, tester_id, params)
    for k in ("logits", "difficulty", "ability"):
        assert out[k].shape == (B, 1), (k, out[k].shape)
        assert jnp.allclose(out[k], ref[k], atol=1e-5, rtol=1e-5), k

    # Exercise the tiled + padded batch path (grid > 1, parallel batch axis).
    B2 = 200
    kx2, kt2 = jax.random.split(jax.random.PRNGKey(1), 2)
    item_repr2 = jax.random.normal(kx2, (B2, F), jnp.float32)
    tester_id2 = jax.random.randint(kt2, (B2,), 0, NUM_TESTERS, jnp.int32)
    out2 = irt1pl_forward(item_repr2, tester_id2, params, batch_tile=128)
    jax.block_until_ready(out2)
    ref2 = _reference(item_repr2, tester_id2, params)
    for k in ("logits", "difficulty", "ability"):
        assert out2[k].shape == (B2, 1), (k, out2[k].shape)
        assert jnp.allclose(out2[k], ref2[k], atol=1e-5, rtol=1e-5), k

    print("KERNEL_OK")
</pallas_src>

<mosaic_0001>
module attributes {stable_mosaic.version = 11 : i64} {
  func.func @_irt1pl_kernel(%arg0: i32, %arg1: memref<32x8xf32, #tpu.memory_space<vmem>>, %arg2: memref<16x32xf32, #tpu.memory_space<vmem>>, %arg3: memref<16x1xf32, #tpu.memory_space<vmem>>, %arg4: memref<16x1xf32, #tpu.memory_space<vmem>>, %arg5: memref<1x1xf32, #tpu.memory_space<smem>>, %arg6: memref<1x8xf32, #tpu.memory_space<vmem>>) attributes {dimension_semantics = [#tpu.dimension_semantics<parallel>], iteration_bounds = array<i64: 1>, scalar_prefetch = 0 : i64, scratch_operands = 0 : i64, tpu.core_type = #tpu.core_type<tc>, window_params = [{transform_indices = @transform_0, window_bounds = array<i64: 32, 8>}, {pipeline_mode = #tpu.pipeline_mode<synchronous>, transform_indices = @transform_1, window_bounds = array<i64: 16, 32>}, {pipeline_mode = #tpu.pipeline_mode<synchronous>, transform_indices = @transform_2, window_bounds = array<i64: 16, 1>}, {pipeline_mode = #tpu.pipeline_mode<synchronous>, transform_indices = @transform_3, window_bounds = array<i64: 16, 1>}, {transform_indices = @transform_4, window_bounds = array<i64: 1, 1>}, {transform_indices = @transform_5, window_bounds = array<i64: 1, 8>}]} {
    %c0 = arith.constant 0 : index
    %c0_0 = arith.constant 0 : index
    %0 = vector.load %arg2[%c0, %c0_0] : memref<16x32xf32, #tpu.memory_space<vmem>>, vector<16x32xf32>
    %c0_1 = arith.constant 0 : index
    %c0_2 = arith.constant 0 : index
    %1 = vector.load %arg1[%c0_1, %c0_2] : memref<32x8xf32, #tpu.memory_space<vmem>>, vector<32x8xf32>
    %cst = arith.constant dense<0.000000e+00> : vector<16x8xf32>
    %2 = tpu.matmul %0, %1, %cst {dimension_numbers = #tpu.dot_dimension_numbers<[1], [0], [0], [1], [0, 0, 1, 1], [], []>} : vector<16x32xf32>, vector<32x8xf32>, vector<16x8xf32> -> vector<16x8xf32>
    %c0_3 = arith.constant 0 : index
    %c0_4 = arith.constant 0 : index
    %3 = vector.load %arg3[%c0_3, %c0_4] : memref<16x1xf32, #tpu.memory_space<vmem>>, vector<16x1xf32>
    %4 = vector.broadcast %3 : vector<16x1xf32> to vector<16x8xf32>
    %5 = arith.addf %2, %4 : vector<16x8xf32>
    %6 = math.tanh %5 : vector<16x8xf32>
    %c0_5 = arith.constant 0 : index
    %c0_6 = arith.constant 0 : index
    %7 = vector.load %arg4[%c0_5, %c0_6] : memref<16x1xf32, #tpu.memory_space<vmem>>, vector<16x1xf32>
    %8 = vector.broadcast %7 : vector<16x1xf32> to vector<16x8xf32>
    %9 = arith.mulf %6, %8 : vector<16x8xf32>
    %cst_7 = arith.constant dense<0.000000e+00> : vector<8xf32>
    %10 = vector.multi_reduction <add>, %9, %cst_7 [0] : vector<16x8xf32> to vector<8xf32>
    %11 = vector.shape_cast %10 : vector<8xf32> to vector<1x8xf32>
    %c0_8 = arith.constant 0 : index
    %c0_9 = arith.constant 0 : index
    %12 = memref.load %arg5[%c0_8, %c0_9] : memref<1x1xf32, #tpu.memory_space<smem>>
    %13 = vector.broadcast %12 : f32 to vector<1x8xf32>
    %14 = arith.addf %11, %13 : vector<1x8xf32>
    %c0_10 = arith.constant 0 : index
    %c0_11 = arith.constant 0 : index
    %15 = vector.load %arg6[%c0_10, %c0_11] : memref<1x8xf32, #tpu.memory_space<vmem>>, vector<1x8xf32>
    tpu.vector_store %arg6[%c0_10, %c0_11], %14 {strides = array<i32>} : memref<1x8xf32, #tpu.memory_space<vmem>>, vector<1x8xf32>,
    return
  }
  func.func @transform_0(%arg0: i32) -> (i32, i32) {
    %c0_i32 = arith.constant 0 : i32
    %c0_i32_0 = arith.constant 0 : i32
    return %c0_i32, %arg0 : i32, i32
  }
  func.func @transform_1(%arg0: i32) -> (i32, i32) {
    %c0_i32 = arith.constant 0 : i32
    %c0_i32_0 = arith.constant 0 : i32
    %c0_i32_1 = arith.constant 0 : i32
    return %c0_i32, %c0_i32_0 : i32, i32
  }
  func.func @transform_2(%arg0: i32) -> (i32, i32) {
    %c0_i32 = arith.constant 0 : i32
    %c0_i32_0 = arith.constant 0 : i32
    %c0_i32_1 = arith.constant 0 : i32
    return %c0_i32, %c0_i32_0 : i32, i32
  }
  func.func @transform_3(%arg0: i32) -> (i32, i32) {
    %c0_i32 = arith.constant 0 : i32
    %c0_i32_0 = arith.constant 0 : i32
    %c0_i32_1 = arith.constant 0 : i32
    return %c0_i32, %c0_i32_0 : i32, i32
  }
  func.func @transform_4(%arg0: i32) -> (i32, i32) {
    %c0_i32 = arith.constant 0 : i32
    %c0_i32_0 = arith.constant 0 : i32
    %c0_i32_1 = arith.constant 0 : i32
    return %c0_i32, %c0_i32_0 : i32, i32
  }
  func.func @transform_5(%arg0: i32) -> (i32, i32) {
    %c0_i32 = arith.constant 0 : i32
    %c0_i32_0 = arith.constant 0 : i32
    return %c0_i32, %arg0 : i32, i32
  }
}

</mosaic_0001>

<bundles_post_ra>
// kernel: tpu_custom_call.1
= control target key start
LH: loop header
LB: loop body
LE: loop exit
PB: predicated region body
PF: predicated region fallthrough
CT: control target
= control target key end

     0   :  { %vm40_vm0 = vcmask 261120   ;;  %v226_v6 = vmov 0   ;;  %s305_s0 = inlined_call_operand.vmem [shape: f32[32,8], index: 0, kind: input, shape index: {}]   ;;  %s306_s1 = inlined_call_operand.vmem [shape: f32[16,32], index: 1, kind: input, shape index: {}]   ;;  %s307_s2 = inlined_call_operand.vmem [shape: f32[16,1], index: 2, kind: input, shape index: {}]   ;;  %s308_s3 = inlined_call_operand.vmem [shape: f32[16,1], index: 3, kind: input, shape index: {}]   ;;  %s309_s4 = inlined_call_operand.<no memory space> [shape: f32[1,1], index: 4, kind: input, shape index: {}]   ;;  %s310_s5 = inlined_call_operand.hbm [shape: f32[1,8], index: 5, kind: output, shape index: {}]  }
   0x1   :  { %v24_v0 = vld [vmem:[%s305_s0] sm:$0xff]  ;;  %v25_v1 = vld [vmem:[%s305_s0 + $0x8] sm:$0xff]  ;;  %v26_v2 = vld [vmem:[%s305_s0 + $0x10] sm:$0xff]  ;;  %196 = vset.pattern.permute.xlu0 %v226_v6  ;;  %197 = vset.pattern.permute.xlu1 %v226_v6 }
   0x2   :  { %v186_v3 = vpack.c.bf16 %v25_v1, %v24_v0  ;;  %v27_v4 = vld [vmem:[%s305_s0 + $0x18] sm:$0xff]  ;;  %v22_v5 = vld [vmem:[%s306_s1] sm:$0xff] }
   0x3   :  { %v190_v7 = vpack.c.bf16 %v27_v4, %v26_v2  ;;  %183 = vmatprep.mubr.msk.f32.mxu0 %vm40_vm0, %v22_v5  ;;  %v28_v8 = vld [vmem:[%s307_s2] sm:$0xff] }
   0x4   :  { %v124_v9 = vld [vmem:[%s308_s3] sm:$0xff]  ;;  %187 = vmatprep.subr.bf16.mxu0 %v186_v3  ;;  %32 = vperm.xlu0 %196, %v28_v8  }
   0x5   :  { %11 = vsyncpa [#allocation4], 0  ;;  %189 = vmatpush3.bf16.msra.mxu0 %v186_v3  ;;  %v29_v10 = vld [vmem:[%s307_s2 + $0x8] sm:$0xff]  ;;  %128 = vperm.xlu1 %197, %v124_v9   ;;  %vm138_vm1 = vcmask 64512   ;;  %v149_v33 = vstv %s309_s4  ;;  %vm151_vm2 = vcmask 57344  }
   0x6   :  { %191 = vmatprep.subr.bf16.mxu0 %v190_v7  ;;  %v125_v11 = vld [vmem:[%s308_s3 + $0x8] sm:$0xff]  ;;  %s227_s3 = smov [#allocation3]  }
   0x7   :  { %v23_v12 = vld [vmem:[%s306_s1 + $0x8] sm:$0xff]  ;;  %s159_s12 = sshll.u32 %s227_s3, 4  ;;  %s160_s12 = int_to_ptr.vmem [resolvable:$true] %s159_s12 }
   0x8   :  { %37 = vperm.xlu0 %196, %v29_v10   ;;  %s202_s13 = scalar_lea.vmem %s160_s12, 16  ;;  %s206_s14 = scalar_lea.vmem %s160_s12, 32 }
   0x9   :  { %193 = vmatpush3.bf16.msra.mxu0 %v190_v7  ;;  %133 = vperm.xlu1 %197, %v125_v11   ;;  %p203_p0 = scmp.ne.s32.totalorder %s160_s12, %s202_s13  ;;  %p207_p1 = scmp.lt.s32.totalorder %s160_s12, %s160_s12 }
   0xa   :  { %p208_p2 = scmp.lt.s32.totalorder %s206_s14, %s202_s13 }
   0xc   :  { %184 = vmatmul.mubr.msk.f32.vlgmr.msra.gmra.mrb[0].mxu0 %vm40_vm0, %v23_v12  ;;  %p209_p3 = por %p208_p2, %p207_p1 }
   0xe   :  { %p210_p4 = pnand %p209_p3, %p203_p0 }
  0x83   :  { %v33_v13 = vpop.permute.xlu0 %32 }
  0x84   :  { %v129_v19 = vpop.permute.xlu1 %128 }
  0x87   :  { %v38_v14 = vpop.permute.xlu0 %37 }
  0x88   :  { %v134_v21 = vpop.permute.xlu1 %133 }
  0xdf   :  { %v185_v15 = vpop.f32.mrb[0].mxu0 }
  0xe0   :  { %v119_v16 = vadd.f32 %v185_v15, %v38_v14  ;;  %v113_v17 = vpop.f32.mrb[1].mxu0 }
  0xe1   :  { %v114_v18 = vadd.f32 %v113_v17, %v33_v13 }
  0xe2   :  { %198 = vtanh.f32 %v119_v16 }
  0xe3   :  { %200 = vtanh.f32 %v114_v18 }
  0xec   :  { %v199_v20 = vpop.eup %198 }
  0xed   :  { %v201_v22 = vpop.eup %200  ;;  %v137_v23 = vmul.f32 %v199_v20, %v134_v21 }
  0xee   :  { %v136_v24 = vmul.f32 %v201_v22, %v129_v19 }
  0xef   :  { %v140_v25 = vsel %vm138_vm1, %v137_v23, 0.0 }
  0xf0   :  { %v139_v26 = vsel %vm138_vm1, %v136_v24, 0.0 }
  0xf1   :  { %v141_v27 = vadd.f32 %v140_v25, %v139_v26 }
  0xf3   :  { %v142_v28 = vrot.slane %v141_v27, 4 }
  0xf5   :  { %v143_v29 = vadd.f32 %v142_v28, %v141_v27 }
  0xf7   :  { %v144_v30 = vrot.slane %v143_v29, 2 }
  0xf9   :  { %v145_v31 = vadd.f32 %v144_v30, %v143_v29 }
  0xfb   :  { %v146_v32 = vrot.slane %v145_v31, 1 }
  0xfd   :  { %v147_v34 = vadd.f32 %v146_v32, %v145_v31 }
  0xff   :  { %v150_v35 = vadd.f32 %v149_v33, %v147_v34 }
 0x101   :  { %152 = vst.msk [vmem:[#allocation3] sm:$0x1] %vm151_vm2, %v150_v35 }
 0x102   :  { %213 = shalt.err (!%p210_p4)
}
 0x103   :  { %s214_s17 = scalar_lea.hbm %s310_s5, 16 }
 0x104   :  { %p215_p5 = scmp.ne.s32.totalorder %s310_s5, %s214_s17  ;;  %p218_p6 = scmp.lt.u32.totalorder %s214_s17, %s310_s5 }
 0x106   :  { %p220_p7 = pnand %p218_p6, %p215_p5 }
 0x108   :  { %223 = shalt.err (!%p220_p7)
}
 0x109   :  { %162 = dma.vmem_to_hbm [thread:$0]  %s160_s12, 16, %s310_s5, [#allocation4]  }
 0x10a   :  { %224 = dma.done.wait [#allocation4], 16  }
 0x10b   :  { %225 = vsyncadd [#allocation4], 4294967280 }
 0x10c   :  { %166 = vsyncpa [#allocation4], 1 }

</bundles_post_ra>
